<compile_context>
chip_gen: v6e
topology: v6e:2x2x1
jax: 0.10.0
libtpu: 0.0.40
codegen_flags: <defaults>
</compile_context>

<pallas_src>
import jax
import jax.numpy as jnp
from jax import lax
from jax.experimental import pallas as pl
from jax.experimental.pallas import tpu as pltpu

# ---- "cfg" constants (synthetic, small) -------------------------------------
GRID_SIZE = 8        # cfg.grid_size
PREV_HOURS = 4       # cfg.prev_hours
FEATURE_COUNT = 4
PREDICTION_HORIZON = 2
BATCH = 2

IN_FEATURES = FEATURE_COUNT * GRID_SIZE * GRID_SIZE * PREV_HOURS      # 1024
OUT_FEATURES = GRID_SIZE * GRID_SIZE * PREDICTION_HORIZON             # 128


# ---- Pallas kernel: y = x @ W^T + b  (W kept in native (N, K) layout) --------
def _linear_kernel(x_ref, w_ref, b_ref, o_ref):
    # x_ref: (B, K)  VMEM
    # w_ref: (N, K)  VMEM   (native nn.Linear weight layout, no transpose)
    # b_ref: (1, N)  VMEM
    # o_ref: (B, N)  VMEM   (N = 128 -> full-lane, unmasked stores)
    acc = lax.dot_general(
        x_ref[...], w_ref[...],
        dimension_numbers=(((1,), (1,)), ((), ())),   # contract on K of both
        preferred_element_type=jnp.float32)
    o_ref[...] = (acc + b_ref[...]).astype(o_ref.dtype)


def linear_pallas(x_flat, weight, bias):
    """x_flat: (B, K) f32; weight: (N, K) f32 (PyTorch layout); bias: (N,) f32."""
    B, K = x_flat.shape
    N = weight.shape[0]
    b2 = bias.reshape(1, N)

    cost = pl.CostEstimate(
        flops=2 * B * K * N,
        transcendentals=0,
        bytes_accessed=4 * (B * K + N * K + N + B * N),
    )

    return pl.pallas_call(
        _linear_kernel,
        out_shape=jax.ShapeDtypeStruct((B, N), x_flat.dtype),
        in_specs=[
            pl.BlockSpec(memory_space=pltpu.MemorySpace.VMEM),
            pl.BlockSpec(memory_space=pltpu.MemorySpace.VMEM),
            pl.BlockSpec(memory_space=pltpu.MemorySpace.VMEM),
        ],
        out_specs=pl.BlockSpec(memory_space=pltpu.MemorySpace.VMEM),
        cost_estimate=cost,
    )(x_flat, weight, b2)


def linear_regression_forward(x, weight, bias):
    """Full module forward: flatten -> linear (Pallas) -> reshape."""
    B = x.shape[0]
    x_flat = x.reshape(B, -1)                            # (B, K), contiguous
    y = linear_pallas(x_flat, weight, bias)              # (B, N), lane-dense
    return y.reshape(B, PREDICTION_HORIZON, 1, GRID_SIZE, GRID_SIZE)


if __name__ == "__main__":
    key = jax.random.PRNGKey(0)
    kx, kw, kb = jax.random.split(key, 3)

    # Deterministic parameter init (mimics nn.Linear uniform(-1/sqrt(K), 1/sqrt(K)))
    bound = 1.0 / (IN_FEATURES ** 0.5)
    weight = jax.random.uniform(kw, (OUT_FEATURES, IN_FEATURES),
                                jnp.float32, minval=-bound, maxval=bound)
    bias = jax.random.uniform(kb, (OUT_FEATURES,),
                              jnp.float32, minval=-bound, maxval=bound)

    # Input: (B, P, F, G, G) — flattened size == IN_FEATURES
    x = jax.random.normal(
        kx, (BATCH, PREV_HOURS, FEATURE_COUNT, GRID_SIZE, GRID_SIZE), jnp.float32)

    out = linear_regression_forward(x, weight, bias)
    out = jax.block_until_ready(out)

    # Reference check in plain JAX
    ref = (x.reshape(BATCH, -1) @ weight.T + bias).reshape(
        BATCH, PREDICTION_HORIZON, 1, GRID_SIZE, GRID_SIZE)
    assert out.shape == (BATCH, PREDICTION_HORIZON, 1, GRID_SIZE, GRID_SIZE)
    assert jnp.allclose(out, ref, atol=1e-5, rtol=1e-5)

    print("KERNEL_OK")
</pallas_src>

<mosaic_0001>
module attributes {stable_mosaic.version = 11 : i64} {
  func.func @_linear_kernel(%arg0: memref<2x1024xf32, #tpu.memory_space<vmem>>, %arg1: memref<128x1024xf32, #tpu.memory_space<vmem>>, %arg2: memref<1x128xf32, #tpu.memory_space<vmem>>, %arg3: memref<2x128xf32, #tpu.memory_space<vmem>>) attributes {dimension_semantics = [], scalar_prefetch = 0 : i64, scratch_operands = 0 : i64, tpu.core_type = #tpu.core_type<tc>} {
    %c0 = arith.constant 0 : index
    %c0_0 = arith.constant 0 : index
    %0 = vector.load %arg0[%c0, %c0_0] : memref<2x1024xf32, #tpu.memory_space<vmem>>, vector<2x1024xf32>
    %c0_1 = arith.constant 0 : index
    %c0_2 = arith.constant 0 : index
    %1 = vector.load %arg1[%c0_1, %c0_2] : memref<128x1024xf32, #tpu.memory_space<vmem>>, vector<128x1024xf32>
    %cst = arith.constant dense<0.000000e+00> : vector<2x128xf32>
    %2 = tpu.matmul %0, %1, %cst {dimension_numbers = #tpu.dot_dimension_numbers<[1], [1], [0], [0], [0, 0, 1, 0], [], []>} : vector<2x1024xf32>, vector<128x1024xf32>, vector<2x128xf32> -> vector<2x128xf32>
    %c0_3 = arith.constant 0 : index
    %c0_4 = arith.constant 0 : index
    %3 = vector.load %arg2[%c0_3, %c0_4] : memref<1x128xf32, #tpu.memory_space<vmem>>, vector<1x128xf32>
    %4 = vector.broadcast %3 : vector<1x128xf32> to vector<2x128xf32>
    %5 = arith.addf %2, %4 : vector<2x128xf32>
    %c0_5 = arith.constant 0 : index
    %c0_6 = arith.constant 0 : index
    %6 = vector.load %arg3[%c0_5, %c0_6] : memref<2x128xf32, #tpu.memory_space<vmem>>, vector<2x128xf32>
    tpu.vector_store %arg3[%c0_5, %c0_6], %5 {strides = array<i32>} : memref<2x128xf32, #tpu.memory_space<vmem>>, vector<2x128xf32>,
    return
  }
}

</mosaic_0001>

<bundles_post_ra>
// kernel: tpu_custom_call.1
= control target key start
LH: loop header
LB: loop body
LE: loop exit
PB: predicated region body
PF: predicated region fallthrough
CT: control target
= control target key end

     0   :  { %8 = vsyncpa [#allocation3], 0  ;;  %s658_s0 = inlined_call_operand.hbm [shape: f32[2,1024], index: 0, kind: input, shape index: {}]   ;;  %s659_s1 = inlined_call_operand.hbm [shape: f32[128,1024], index: 1, kind: input, shape index: {}]   ;;  %s660_s2 = inlined_call_operand.vmem [shape: f32[1,128], index: 2, kind: input, shape index: {}]   ;;  %s661_s3 = inlined_call_operand.hbm [shape: f32[2,128], index: 3, kind: output, shape index: {}]  }
   0x1   :  { %9 = vsyncpa [#allocation6], 0 }
   0x2   :  { %10 = vsyncpa [#allocation4], 0  ;;  %s594_s12 = smov [#allocation2]   ;;  %s595_s14 = smov [#allocation5]  }
   0x3   :  { %s17_s13 = sshll.u32 %s594_s12, 4  ;;  %s26_s15 = sshll.u32 %s595_s14, 4  ;;  %s18_s13 = int_to_ptr.vmem [resolvable:$true] %s17_s13  ;;  %s27_s15 = int_to_ptr.vmem [resolvable:$true] %s26_s15 }
   0x4   :  { %s536_s16 = scalar_lea.vmem %s18_s13, 256  ;;  %p541_p1 = scmp.lt.s32.totalorder %s18_s13, %s18_s13 }
   0x5   :  { %p537_p0 = scmp.ne.s32.totalorder %s18_s13, %s536_s16  ;;  %p542_p2 = scmp.lt.s32.totalorder %s536_s16, %s536_s16 }
   0x7   :  { %p543_p3 = por %p542_p2, %p541_p1 }
   0x9   :  { %p544_p4 = pnand %p543_p3, %p537_p0 }
   0xb   :  { %547 = shalt.err (!%p544_p4)
}
   0xc   :  { %20 = dma.hbm_to_vmem [thread:$0]  %s658_s0, 256, %s18_s13, [#allocation3]  }
   0xd   :  { %s556_s19 = scalar_lea.vmem %s27_s15, 16384  ;;  %p561_p6 = scmp.lt.s32.totalorder %s27_s15, %s27_s15 }
   0xe   :  { %p557_p5 = scmp.ne.s32.totalorder %s27_s15, %s556_s19  ;;  %p562_p7 = scmp.lt.s32.totalorder %s556_s19, %s556_s19 }
  0x10   :  { %p563_p8 = por %p562_p7, %p561_p6 }
  0x12   :  { %p564_p9 = pnand %p563_p8, %p557_p5 }
  0x14   :  { %567 = shalt.err (!%p564_p9)
}
  0x15   :  { %s596_s20 = smov 1024   ;;  %s597_s21 = smov 64  }
  0x16   :  { %32 = dma.hbm_to_vmem [thread:$0]  %s659_s1, 16384, %s27_s15, [#allocation6], %s596_s20, %s596_s20, %s597_s21  }
  0x17   :  { %588 = dma.done.wait [#allocation3], 256  }
  0x18   :  { %589 = vsyncadd [#allocation3], 4294967040 }
  0x19   :  { %590 = dma.done.wait [#allocation6], 16384  }
  0x1a   :  { %591 = vsyncadd [#allocation6], 4294950912  ;;  %v164_v0 = vld [vmem:[#allocation5 + $0x3c8] sm:$0xff]  ;;  %v166_v1 = vld [vmem:[#allocation5 + $0x3d8] sm:$0xff]  ;;  %v598_v14 = vmov 1983009808   ;;  %v184_v16 = vlaneseq }
  0x1b   :  { %v163_v2 = vld [vmem:[#allocation5 + $0x3c0] sm:$0xff]  ;;  %222 = vmatprep.subr.mxu0 %v164_v0  ;;  %292 = vmatprep.subr.mxu1 %v166_v1  ;;  %v165_v3 = vld [vmem:[#allocation5 + $0x3d0] sm:$0xff]  ;;  %v156_v4 = vld [vmem:[#allocation5 + $0x388] sm:$0xff]  ;;  %v182_v15 = vunpack.c.l.s4 %v598_v14  ;;  %s599_s24 = smov [#allocation7]  }
  0x1c   :  { %v158_v5 = vld [vmem:[#allocation5 + $0x398] sm:$0xff]  ;;  %223 = vmatpush1.xpose.msra.mxu0 %v163_v2  ;;  %293 = vmatpush1.xpose.msra.mxu1 %v165_v3  ;;  %v155_v6 = vld [vmem:[#allocation5 + $0x380] sm:$0xff]  ;;  %v157_v7 = vld [vmem:[#allocation5 + $0x390] sm:$0xff]  ;;  %v185_v22 = vshrl.u32 %v184_v16, 7  ;;  %s509_s25 = sshll.u32 %s599_s24, 4  ;;  %s510_s25 = int_to_ptr.vmem [resolvable:$true] %s509_s25 }
  0x1d   :  { %224 = vmatprep.subr.mxu0 %v156_v4  ;;  %294 = vmatprep.subr.mxu1 %v158_v5  ;;  %v148_v8 = vld [vmem:[#allocation5 + $0x348] sm:$0xff]  ;;  %v150_v9 = vld [vmem:[#allocation5 + $0x358] sm:$0xff]  ;;  %v147_v10 = vld [vmem:[#allocation5 + $0x340] sm:$0xff]  ;;  %v183_v21 = vunpack.c.0.s8 %v182_v15  ;;  %s568_s26 = scalar_lea.vmem %s510_s25, 32  ;;  %p573_p11 = scmp.lt.s32.totalorder %s510_s25, %s510_s25 }
  0x1e   :  { %v149_v11 = vld [vmem:[#allocation5 + $0x350] sm:$0xff]  ;;  %v140_v12 = vld [vmem:[#allocation5 + $0x308] sm:$0xff]  ;;  %v142_v13 = vld [vmem:[#allocation5 + $0x318] sm:$0xff]  ;;  %p569_p10 = scmp.ne.s32.totalorder %s510_s25, %s568_s26  ;;  %p574_p12 = scmp.lt.s32.totalorder %s568_s26, %s568_s26 }
  0x1f   :  { %v139_v17 = vld [vmem:[#allocation5 + $0x300] sm:$0xff]  ;;  %v141_v18 = vld [vmem:[#allocation5 + $0x310] sm:$0xff]  ;;  %v132_v19 = vld [vmem:[#allocation5 + $0x2c8] sm:$0xff]  ;;  %v626_v27 = vsub.s32 %v183_v21, %v185_v22 }
  0x20   :  { %225 = vmatpush1.xpose.msra.mxu0 %v155_v6  ;;  %295 = vmatpush1.xpose.msra.mxu1 %v157_v7  ;;  %v134_v20 = vld [vmem:[#allocation5 + $0x2d8] sm:$0xff]  ;;  %v131_v23 = vld [vmem:[#allocation5 + $0x2c0] sm:$0xff]  ;;  %v133_v24 = vld [vmem:[#allocation5 + $0x2d0] sm:$0xff]  ;;  %p575_p13 = por %p574_p12, %p573_p11 }
  0x21   :  { %226 = vmatprep.subr.mxu0 %v148_v8  ;;  %296 = vmatprep.subr.mxu1 %v150_v9  ;;  %v124_v25 = vld [vmem:[#allocation5 + $0x288] sm:$0xff]  ;;  %v126_v26 = vld [vmem:[#allocation5 + $0x298] sm:$0xff]  ;;  %v123_v28 = vld [vmem:[#allocation5 + $0x280] sm:$0xff] }
  0x22   :  { %v125_v29 = vld [vmem:[#allocation5 + $0x290] sm:$0xff]  ;;  %v116_v30 = vld [vmem:[#allocation5 + $0x248] sm:$0xff]  ;;  %v118_v31 = vld [vmem:[#allocation5 + $0x258] sm:$0xff]  ;;  %p576_p0 = pnand %p575_p13, %p569_p10 }
  0x23   :  { %v41_v32 = vld [vmem:[#allocation2] sm:$0xff]  ;;  %v115_v35 = vld [vmem:[#allocation5 + $0x240] sm:$0xff]  ;;  %v108_v37 = vld [vmem:[#allocation5 + $0x208] sm:$0xff] }
  0x24   :  { %227 = vmatpush1.xpose.msra.mxu0 %v147_v10  ;;  %297 = vmatpush1.xpose.msra.mxu1 %v149_v11  ;;  %v629_v33 = vrot.slane %v41_v32, %v626_v27  ;;  %v180_v34 = vcombine.high %v41_v32, %v41_v32  ;;  %v117_v36 = vld [vmem:[#allocation5 + $0x250] sm:$0xff]  ;;  %v110_v38 = vld [vmem:[#allocation5 + $0x218] sm:$0xff]  ;;  %v107_v42 = vld [vmem:[#allocation5 + $0x200] sm:$0xff] }
  0x25   :  { %228 = vmatprep.subr.mxu0 %v140_v12  ;;  %298 = vmatprep.subr.mxu1 %v142_v13  ;;  %v109_v43 = vld [vmem:[#allocation5 + $0x210] sm:$0xff]  ;;  %v100_v44 = vld [vmem:[#allocation5 + $0x1c8] sm:$0xff]  ;;  %v102_v45 = vld [vmem:[#allocation5 + $0x1d8] sm:$0xff] }
  0x26   :  { %v195_v39 = vcombine.high %v629_v33, %v629_v33  ;;  %v634_v40 = vrot.slane %v180_v34, %v626_v27  ;;  %v99_v46 = vld [vmem:[#allocation5 + $0x1c0] sm:$0xff]  ;;  %v101_v47 = vld [vmem:[#allocation5 + $0x1d0] sm:$0xff]  ;;  %v92_v48 = vld [vmem:[#allocation5 + $0x188] sm:$0xff] }
  0x27   :  { %v94_v49 = vld [vmem:[#allocation5 + $0x198] sm:$0xff]  ;;  %v91_v50 = vld [vmem:[#allocation5 + $0x180] sm:$0xff]  ;;  %v93_v51 = vld [vmem:[#allocation5 + $0x190] sm:$0xff] }
  0x28   :  { %229 = vmatpush1.xpose.msra.mxu0 %v139_v17  ;;  %299 = vmatpush1.xpose.msra.mxu1 %v141_v18  ;;  %v196_v41 = vcombine.high %v634_v40, %v634_v40  ;;  %v84_v52 = vld [vmem:[#allocation5 + $0x148] sm:$0xff]  ;;  %v86_v53 = vld [vmem:[#allocation5 + $0x158] sm:$0xff]  ;;  %v83_v54 = vld [vmem:[#allocation5 + $0x140] sm:$0xff] }
  0x29   :  { %230 = vmatprep.subr.mxu0 %v132_v19  ;;  %300 = vmatprep.subr.mxu1 %v134_v20  ;;  %v85_v55 = vld [vmem:[#allocation5 + $0x150] sm:$0xff]  ;;  %v76_v56 = vld [vmem:[#allocation5 + $0x108] sm:$0xff]  ;;  %v78_v57 = vld [vmem:[#allocation5 + $0x118] sm:$0xff] }
  0x2a   :  { %286 = vmatprep.mubr.f32.mxu0 %v195_v39  ;;  %356 = vmatprep.mubr.f32.mxu1 %v196_v41  ;;  %v75_v58 = vld [vmem:[#allocation5 + $0x100] sm:$0xff]  ;;  %v77_v59 = vld [vmem:[#allocation5 + $0x110] sm:$0xff]  ;;  %v68_v60 = vld [vmem:[#allocation5 + $0xc8] sm:$0xff] }
  0x2b   :  { %v70_v61 = vld [vmem:[#allocation5 + $0xd8] sm:$0xff]  ;;  %v67_v62 = vld [vmem:[#allocation5 + $0xc0] sm:$0xff]  ;;  %v69_v63 = vld [vmem:[#allocation5 + $0xd0] sm:$0xff] }
  0x2c   :  { %231 = vmatpush1.xpose.msra.mxu0 %v131_v23  ;;  %301 = vmatpush1.xpose.msra.mxu1 %v133_v24  ;;  %v60_v0 = vld [vmem:[#allocation5 + $0x88] sm:$0xff]  ;;  %v62_v1 = vld [vmem:[#allocation5 + $0x98] sm:$0xff]  ;;  %v59_v2 = vld [vmem:[#allocation5 + $0x80] sm:$0xff] }
  0x2d   :  { %232 = vmatprep.subr.mxu0 %v124_v25  ;;  %302 = vmatprep.subr.mxu1 %v126_v26  ;;  %v61_v3 = vld [vmem:[#allocation5 + $0x90] sm:$0xff]  ;;  %v52_v4 = vld [vmem:[#allocation5 + $0x48] sm:$0xff]  ;;  %v54_v5 = vld [vmem:[#allocation5 + $0x58] sm:$0xff] }
  0x2e   :  { %v42_v6 = vld [vmem:[#allocation2 + $0x8] sm:$0xff]  ;;  %v51_v7 = vld [vmem:[#allocation5 + $0x40] sm:$0xff]  ;;  %v53_v8 = vld [vmem:[#allocation5 + $0x50] sm:$0xff] }
  0x2f   :  { %v44_v9 = vld [vmem:[#allocation5 + $0x8] sm:$0xff]  ;;  %v46_v10 = vld [vmem:[#allocation5 + $0x18] sm:$0xff]  ;;  %v197_v11 = vcombine.high %v42_v6, %v42_v6  ;;  %v43_v12 = vld [vmem:[#allocation5] sm:$0xff]  ;;  %v639_v16 = vrot.slane %v42_v6, %v626_v27 }
  0x30   :  { %233 = vmatpush1.xpose.msra.mxu0 %v123_v28  ;;  %303 = vmatpush1.xpose.msra.mxu1 %v125_v29  ;;  %v45_v13 = vld [vmem:[#allocation5 + $0x10] sm:$0xff]  ;;  %v168_v14 = vld [vmem:[#allocation5 + $0x3e8] sm:$0xff]  ;;  %v170_v15 = vld [vmem:[#allocation5 + $0x3f8] sm:$0xff] }
  0x31   :  { %234 = vmatprep.subr.mxu0 %v116_v30  ;;  %304 = vmatprep.subr.mxu1 %v118_v31  ;;  %v642_v17 = vrot.slane %v197_v11, %v626_v27  ;;  %v167_v18 = vld [vmem:[#allocation5 + $0x3e0] sm:$0xff]  ;;  %v169_v19 = vld [vmem:[#allocation5 + $0x3f0] sm:$0xff]  ;;  %v160_v20 = vld [vmem:[#allocation5 + $0x3a8] sm:$0xff]  ;;  %v212_v22 = vcombine.high %v639_v16, %v639_v16 }
  0x32   :  { %v162_v21 = vld [vmem:[#allocation5 + $0x3b8] sm:$0xff]  ;;  %v159_v24 = vld [vmem:[#allocation5 + $0x3a0] sm:$0xff]  ;;  %v161_v25 = vld [vmem:[#allocation5 + $0x3b0] sm:$0xff] }
  0x33   :  { %v213_v23 = vcombine.high %v642_v17, %v642_v17  ;;  %v152_v26 = vld [vmem:[#allocation5 + $0x368] sm:$0xff]  ;;  %v154_v27 = vld [vmem:[#allocation5 + $0x378] sm:$0xff]  ;;  %v151_v28 = vld [vmem:[#allocation5 + $0x360] sm:$0xff] }
  0x34   :  { %235 = vmatpush1.xpose.msra.mxu0 %v115_v35  ;;  %305 = vmatpush1.xpose.msra.mxu1 %v117_v36  ;;  %v153_v29 = vld [vmem:[#allocation5 + $0x370] sm:$0xff]  ;;  %v144_v30 = vld [vmem:[#allocation5 + $0x328] sm:$0xff]  ;;  %v146_v31 = vld [vmem:[#allocation5 + $0x338] sm:$0xff] }
  0x35   :  { %236 = vmatprep.subr.mxu0 %v108_v37  ;;  %306 = vmatprep.subr.mxu1 %v110_v38  ;;  %v143_v32 = vld [vmem:[#allocation5 + $0x320] sm:$0xff]  ;;  %v136_v34 = vld [vmem:[#allocation5 + $0x2e8] sm:$0xff]  ;;  %v138_v35 = vld [vmem:[#allocation5 + $0x2f8] sm:$0xff] }
  0x36   :  { %v135_v36 = vld [vmem:[#allocation5 + $0x2e0] sm:$0xff]  ;;  %v137_v37 = vld [vmem:[#allocation5 + $0x2f0] sm:$0xff]  ;;  %v128_v38 = vld [vmem:[#allocation5 + $0x2a8] sm:$0xff] }
  0x37   :  { %v130_v39 = vld [vmem:[#allocation5 + $0x2b8] sm:$0xff]  ;;  %v129_v41 = vld [vmem:[#allocation5 + $0x2b0] sm:$0xff]  ;;  %v64_v6 = vld [vmem:[#allocation5 + $0xa8] sm:$0xff] }
  0x38   :  { %237 = vmatpush1.xpose.msra.mxu0 %v107_v42  ;;  %307 = vmatpush1.xpose.msra.mxu1 %v109_v43  ;;  %v120_v42 = vld [vmem:[#allocation5 + $0x268] sm:$0xff]  ;;  %v122_v43 = vld [vmem:[#allocation5 + $0x278] sm:$0xff] }
  0x39   :  { %238 = vmatprep.subr.mxu0 %v100_v44  ;;  %308 = vmatprep.subr.mxu1 %v102_v45  ;;  %v119_v44 = vld [vmem:[#allocation5 + $0x260] sm:$0xff]  ;;  %v121_v45 = vld [vmem:[#allocation5 + $0x270] sm:$0xff]  ;;  %v58_v11 = vld [vmem:[#allocation5 + $0x78] sm:$0xff] }
  0x3c   :  { %239 = vmatpush1.xpose.msra.mxu0 %v99_v46  ;;  %309 = vmatpush1.xpose.msra.mxu1 %v101_v47  ;;  %v112_v46 = vld [vmem:[#allocation5 + $0x228] sm:$0xff]  ;;  %v114_v47 = vld [vmem:[#allocation5 + $0x238] sm:$0xff] }
  0x3d   :  { %240 = vmatprep.subr.mxu0 %v92_v48  ;;  %310 = vmatprep.subr.mxu1 %v94_v49  ;;  %v111_v48 = vld [vmem:[#allocation5 + $0x220] sm:$0xff]  ;;  %v113_v49 = vld [vmem:[#allocation5 + $0x230] sm:$0xff] }
  0x40   :  { %241 = vmatpush1.xpose.msra.mxu0 %v91_v50  ;;  %311 = vmatpush1.xpose.msra.mxu1 %v93_v51  ;;  %v104_v50 = vld [vmem:[#allocation5 + $0x1e8] sm:$0xff]  ;;  %v106_v51 = vld [vmem:[#allocation5 + $0x1f8] sm:$0xff] }
  0x41   :  { %242 = vmatprep.subr.mxu0 %v84_v52  ;;  %312 = vmatprep.subr.mxu1 %v86_v53  ;;  %v103_v52 = vld [vmem:[#allocation5 + $0x1e0] sm:$0xff]  ;;  %v105_v53 = vld [vmem:[#allocation5 + $0x1f0] sm:$0xff] }
  0x44   :  { %243 = vmatpush1.xpose.msra.mxu0 %v83_v54  ;;  %313 = vmatpush1.xpose.msra.mxu1 %v85_v55  ;;  %v96_v54 = vld [vmem:[#allocation5 + $0x1a8] sm:$0xff]  ;;  %v98_v55 = vld [vmem:[#allocation5 + $0x1b8] sm:$0xff] }
  0x45   :  { %244 = vmatprep.subr.mxu0 %v76_v56  ;;  %314 = vmatprep.subr.mxu1 %v78_v57  ;;  %v95_v56 = vld [vmem:[#allocation5 + $0x1a0] sm:$0xff]  ;;  %v97_v57 = vld [vmem:[#allocation5 + $0x1b0] sm:$0xff] }
  0x48   :  { %245 = vmatpush1.xpose.msra.mxu0 %v75_v58  ;;  %315 = vmatpush1.xpose.msra.mxu1 %v77_v59  ;;  %v88_v58 = vld [vmem:[#allocation5 + $0x168] sm:$0xff]  ;;  %v90_v59 = vld [vmem:[#allocation5 + $0x178] sm:$0xff] }
  0x49   :  { %246 = vmatprep.subr.mxu0 %v68_v60  ;;  %316 = vmatprep.subr.mxu1 %v70_v61  ;;  %v87_v60 = vld [vmem:[#allocation5 + $0x160] sm:$0xff]  ;;  %v89_v61 = vld [vmem:[#allocation5 + $0x170] sm:$0xff] }
  0x4c   :  { %247 = vmatpush1.xpose.msra.mxu0 %v67_v62  ;;  %317 = vmatpush1.xpose.msra.mxu1 %v69_v63  ;;  %v80_v62 = vld [vmem:[#allocation5 + $0x128] sm:$0xff]  ;;  %v82_v63 = vld [vmem:[#allocation5 + $0x138] sm:$0xff] }
  0x4d   :  { %248 = vmatprep.subr.mxu0 %v60_v0  ;;  %318 = vmatprep.subr.mxu1 %v62_v1  ;;  %v79_v0 = vld [vmem:[#allocation5 + $0x120] sm:$0xff]  ;;  %v81_v1 = vld [vmem:[#allocation5 + $0x130] sm:$0xff] }
  0x50   :  { %249 = vmatpush1.xpose.msra.mxu0 %v59_v2  ;;  %319 = vmatpush1.xpose.msra.mxu1 %v61_v3  ;;  %v72_v2 = vld [vmem:[#allocation5 + $0xe8] sm:$0xff]  ;;  %v74_v3 = vld [vmem:[#allocation5 + $0xf8] sm:$0xff] }
  0x51   :  { %250 = vmatprep.subr.mxu0 %v52_v4  ;;  %320 = vmatprep.subr.mxu1 %v54_v5  ;;  %v71_v4 = vld [vmem:[#allocation5 + $0xe0] sm:$0xff]  ;;  %v73_v5 = vld [vmem:[#allocation5 + $0xf0] sm:$0xff] }
  0x54   :  { %251 = vmatpush1.xpose.msra.mxu0 %v51_v7  ;;  %321 = vmatpush1.xpose.msra.mxu1 %v53_v8  ;;  %v66_v7 = vld [vmem:[#allocation5 + $0xb8] sm:$0xff]  ;;  %v63_v8 = vld [vmem:[#allocation5 + $0xa0] sm:$0xff] }
  0x55   :  { %252 = vmatprep.subr.mxu0 %v44_v9  ;;  %322 = vmatprep.subr.mxu1 %v46_v10  ;;  %v65_v9 = vld [vmem:[#allocation5 + $0xb0] sm:$0xff]  ;;  %v56_v10 = vld [vmem:[#allocation5 + $0x68] sm:$0xff] }
  0x58   :  { %253 = vmatpush1.xpose.msra.mxu0 %v43_v12  ;;  %323 = vmatpush1.xpose.msra.mxu1 %v45_v13  ;;  %v55_v12 = vld [vmem:[#allocation5 + $0x60] sm:$0xff]  ;;  %v57_v13 = vld [vmem:[#allocation5 + $0x70] sm:$0xff] }
  0x59   :  { %362 = vmatprep.subr.mxu0 %v168_v14  ;;  %432 = vmatprep.subr.mxu1 %v170_v15  ;;  %v48_v14 = vld [vmem:[#allocation5 + $0x28] sm:$0xff]  ;;  %v50_v15 = vld [vmem:[#allocation5 + $0x38] sm:$0xff] }
  0x5b   :  { %287 = vmatmul.mubr.f32.vlgmr.msra.gmra.mxu0 %v629_v33  ;;  %357 = vmatmul.mubr.f32.vlgmr.msra.gmra.mxu1 %v634_v40  ;;  %v145_v33 = vld [vmem:[#allocation5 + $0x330] sm:$0xff]  ;;  %v127_v40 = vld [vmem:[#allocation5 + $0x2a0] sm:$0xff] }
  0x5c   :  { %363 = vmatpush1.xpose.msra.mxu0 %v167_v18  ;;  %433 = vmatpush1.xpose.msra.mxu1 %v169_v19  ;;  %v47_v18 = vld [vmem:[#allocation5 + $0x20] sm:$0xff]  ;;  %v49_v19 = vld [vmem:[#allocation5 + $0x30] sm:$0xff] }
  0x5d   :  { %364 = vmatprep.subr.mxu0 %v160_v20  ;;  %434 = vmatprep.subr.mxu1 %v162_v21 }
  0x5e   :  { %426 = vmatprep.mubr.f32.mxu0 %v212_v22  ;;  %496 = vmatprep.mubr.f32.mxu1 %v213_v23 }
  0x60   :  { %365 = vmatpush1.xpose.msra.mxu0 %v159_v24  ;;  %435 = vmatpush1.xpose.msra.mxu1 %v161_v25  ;;  %v519_v24 = vld [vmem:[%s660_s2] ss:$0 sm:$0xff] }
  0x61   :  { %366 = vmatprep.subr.mxu0 %v152_v26  ;;  %436 = vmatprep.subr.mxu1 %v154_v27 }
  0x64   :  { %367 = vmatpush1.xpose.msra.mxu0 %v151_v28  ;;  %437 = vmatpush1.xpose.msra.mxu1 %v153_v29 }
  0x65   :  { %368 = vmatprep.subr.mxu0 %v144_v30  ;;  %438 = vmatprep.subr.mxu1 %v146_v31 }
  0x68   :  { %369 = vmatpush1.xpose.msra.mxu0 %v143_v32  ;;  %439 = vmatpush1.xpose.msra.mxu1 %v145_v33 }
  0x69   :  { %370 = vmatprep.subr.mxu0 %v136_v34  ;;  %440 = vmatprep.subr.mxu1 %v138_v35 }
  0x6c   :  { %371 = vmatpush1.xpose.msra.mxu0 %v135_v36  ;;  %441 = vmatpush1.xpose.msra.mxu1 %v137_v37 }
  0x6d   :  { %372 = vmatprep.subr.mxu0 %v128_v38  ;;  %442 = vmatprep.subr.mxu1 %v130_v39 }
  0x70   :  { %373 = vmatpush1.xpose.msra.mxu0 %v127_v40  ;;  %443 = vmatpush1.xpose.msra.mxu1 %v129_v41 }
  0x71   :  { %374 = vmatprep.subr.mxu0 %v120_v42  ;;  %444 = vmatprep.subr.mxu1 %v122_v43 }
  0x74   :  { %375 = vmatpush1.xpose.msra.mxu0 %v119_v44  ;;  %445 = vmatpush1.xpose.msra.mxu1 %v121_v45 }
  0x75   :  { %376 = vmatprep.subr.mxu0 %v112_v46  ;;  %446 = vmatprep.subr.mxu1 %v114_v47 }
  0x78   :  { %377 = vmatpush1.xpose.msra.mxu0 %v111_v48  ;;  %447 = vmatpush1.xpose.msra.mxu1 %v113_v49 }
  0x79   :  { %378 = vmatprep.subr.mxu0 %v104_v50  ;;  %448 = vmatprep.subr.mxu1 %v106_v51 }
  0x7c   :  { %379 = vmatpush1.xpose.msra.mxu0 %v103_v52  ;;  %449 = vmatpush1.xpose.msra.mxu1 %v105_v53 }
  0x7d   :  { %380 = vmatprep.subr.mxu0 %v96_v54  ;;  %450 = vmatprep.subr.mxu1 %v98_v55 }
  0x80   :  { %381 = vmatpush1.xpose.msra.mxu0 %v95_v56  ;;  %451 = vmatpush1.xpose.msra.mxu1 %v97_v57 }
  0x81   :  { %382 = vmatprep.subr.mxu0 %v88_v58  ;;  %452 = vmatprep.subr.mxu1 %v90_v59 }
  0x84   :  { %383 = vmatpush1.xpose.msra.mxu0 %v87_v60  ;;  %453 = vmatpush1.xpose.msra.mxu1 %v89_v61 }
  0x85   :  { %384 = vmatprep.subr.mxu0 %v80_v62  ;;  %454 = vmatprep.subr.mxu1 %v82_v63 }
  0x88   :  { %385 = vmatpush1.xpose.msra.mxu0 %v79_v0  ;;  %455 = vmatpush1.xpose.msra.mxu1 %v81_v1 }
  0x89   :  { %386 = vmatprep.subr.mxu0 %v72_v2  ;;  %456 = vmatprep.subr.mxu1 %v74_v3 }
  0x8c   :  { %387 = vmatpush1.xpose.msra.mxu0 %v71_v4  ;;  %457 = vmatpush1.xpose.msra.mxu1 %v73_v5 }
  0x8d   :  { %388 = vmatprep.subr.mxu0 %v64_v6  ;;  %458 = vmatprep.subr.mxu1 %v66_v7 }
  0x90   :  { %389 = vmatpush1.xpose.msra.mxu0 %v63_v8  ;;  %459 = vmatpush1.xpose.msra.mxu1 %v65_v9 }
  0x91   :  { %390 = vmatprep.subr.mxu0 %v56_v10  ;;  %460 = vmatprep.subr.mxu1 %v58_v11 }
  0x94   :  { %391 = vmatpush1.xpose.msra.mxu0 %v55_v12  ;;  %461 = vmatpush1.xpose.msra.mxu1 %v57_v13 }
  0x95   :  { %392 = vmatprep.subr.mxu0 %v48_v14  ;;  %462 = vmatprep.subr.mxu1 %v50_v15 }
  0x98   :  { %393 = vmatpush1.xpose.msra.mxu0 %v47_v18  ;;  %463 = vmatpush1.xpose.msra.mxu1 %v49_v19 }
  0x9b   :  { %427 = vmatmul.mubr.f32.vlgmr.msra.gmra.mxu0 %v639_v16  ;;  %497 = vmatmul.mubr.f32.vlgmr.msra.gmra.mxu1 %v642_v17 }
 0x11b   :  { %v288_v20 = vpop.f32.mrf.mxu0  ;;  %v358_v21 = vpop.f32.mrf.mxu1 }
 0x11c   :  { %v289_v25 = vadd.f32 %v519_v24, %v288_v20 }
 0x11d   :  { %v290_v22 = vpop.f32.mrf.mxu0  ;;  %v360_v23 = vpop.f32.mrf.mxu1 }
 0x11e   :  { %v359_v26 = vadd.f32 %v358_v21, %v289_v25 }
 0x15b   :  { %v428_v27 = vpop.f32.mrf.mxu0  ;;  %v498_v28 = vpop.f32.mrf.mxu1 }
 0x15c   :  { %v429_v29 = vadd.f32 %v428_v27, %v359_v26 }
 0x15d   :  { %v430_v30 = vpop.f32.mrf.mxu0  ;;  %v500_v31 = vpop.f32.mrf.mxu1 }
 0x15e   :  { %v499_v16 = vadd.f32 %v498_v28, %v429_v29 }
 0x160   :  { %502 = vst [vmem:[#allocation7] sm:$0x3] %v499_v16 }
 0x161   :  { %579 = shalt.err (!%p576_p0)
}
 0x162   :  { %512 = dma.vmem_to_hbm [thread:$0]  %s510_s25, 32, %s661_s3, [#allocation4]  }
 0x163   :  { %592 = dma.done.wait [#allocation4], 32  }
 0x164   :  { %593 = vsyncadd [#allocation4], 4294967264 }
 0x165   :  { %516 = vsyncpa [#allocation3], 1 }
 0x166   :  { %517 = vsyncpa [#allocation6], 1 }
 0x167   :  { %518 = vsyncpa [#allocation4], 1 }

</bundles_post_ra>
